<compile_context>
chip_gen: v7x
topology: tpu7x:2x2x1
jax: 0.10.0
libtpu: 0.0.40
codegen_flags: <defaults>
</compile_context>

<pallas_src>
import jax
import jax.numpy as jnp
from jax.experimental import pallas as pl
from jax.experimental.pallas import tpu as pltpu


def _round_up(x, m):
    return -(-x // m) * m


def _make_kernel(n_body):
    """Kernel for stack_depth = n_body + 1 blocks (interior pairs + head pre-fused)."""

    def kernel(*refs):
        if n_body > 0:
            x_ref, w10_ref, b10_ref, w12_ref, b12_ref, wh_ref, bh_ref, out_ref = refs
        else:
            x_ref, w10_ref, b10_ref, wh_ref, bh_ref, out_ref = refs
            w12_ref = b12_ref = None

        # Batch-on-lanes: transpose the (tm, iDim) f32 tile once (XLU has slack)
        # so every later activation is (features, tm) with tm on the lane axis.
        xt = x_ref[...].T                                   # (iDim, tm) f32
        h = xt.astype(jnp.bfloat16)                         # in-kernel cast (VPU)

        # First layer: a = relu(W1[0] @ x^T + b1[0]).
        a = jnp.dot(w10_ref[...], h, preferred_element_type=jnp.float32)   # (hDim, tm)
        a = jnp.maximum(a + b10_ref[...], 0.0).astype(jnp.bfloat16)

        # Fused interior pairs: a = relu(W12[s] @ a + B12[s]).  Static tiny loop.
        for s in range(n_body):
            a = jnp.dot(w12_ref[s], a, preferred_element_type=jnp.float32) # (hDim, tm)
            a = jnp.maximum(a + b12_ref[s], 0.0).astype(jnp.bfloat16)

        # Fused head: ln^T = WH @ a + BH, lane-dense (1, tm) output, then abs().
        ln = jnp.dot(wh_ref[...], a, preferred_element_type=jnp.float32)   # (1, tm)
        out_ref[...] = jnp.abs(ln + bh_ref[0, 0])

    return kernel


def argmaxnet_forward(scores, params):
    """scores: (N, iDim) f32.  params = (w1, b1, w2, b2, wn, bn) in PyTorch
    (out_features, in_features) layout.  Returns (N,) f32 == ln.t()[0]."""
    w1, b1, w2, b2, wn, bn = params
    stack_depth, h_dim, i_dim = w1.shape
    n = scores.shape[0]
    n_body = stack_depth - 1

    # ---- algebraic fusion (products in f32; exact up to reassociation) ------
    w10 = w1[0]                                                # (hDim, iDim)
    b10 = b1[0].reshape(h_dim, 1)                              # (hDim, 1)
    if n_body > 0:
        w12 = jnp.einsum("shi,sij->shj", w1[1:], w2[:-1])      # (n_body, hDim, hDim)
        b12 = (jnp.einsum("shi,si->sh", w1[1:], b2[:-1]) + b1[1:])[..., None]
    wh = wn @ w2[-1]                                           # (1, hDim)
    bh = (wn @ b2[-1] + bn).reshape(1, 1)                      # scalar head bias

    # bf16 MXU operands; biases / accumulation / elementwise stay f32.
    w10_bf = w10.astype(jnp.bfloat16)
    wh_bf = wh.astype(jnp.bfloat16)
    if n_body > 0:
        w12_bf = w12.astype(jnp.bfloat16)

    # ---- batch tiling: big tiles on a "parallel" grid, no wrapper pad/cast ---
    tm_target = 1024
    if n >= 2 * tm_target:
        tm = tm_target
    elif n > tm_target:
        tm = _round_up(-(-n // 2), 128)       # >=2 grid steps for v7x's two TCs
    else:
        tm = _round_up(n, 8)                  # single (possibly partial) block
    nb = -(-n // tm)
    n_alloc = nb * tm                         # padded *output* allocation only (tiny)

    def resident(a):
        zeros = (0,) * a.ndim
        # Full-array block, constant index: fetched once, stays VMEM-resident.
        return pl.BlockSpec(a.shape, lambda i: zeros)

    in_specs = [pl.BlockSpec((tm, i_dim), lambda i: (i, 0)),   # f32 rows (cast in-kernel)
                resident(w10_bf), resident(b10)]
    args = [scores, w10_bf, b10]
    if n_body > 0:
        in_specs += [resident(w12_bf), resident(b12)]
        args += [w12_bf, b12]
    in_specs += [resident(wh_bf),
                 pl.BlockSpec(memory_space=pltpu.MemorySpace.SMEM)]  # scalar head bias
    args += [wh_bf, bh.astype(jnp.float32)]

    out = pl.pallas_call(
        _make_kernel(n_body),
        out_shape=jax.ShapeDtypeStruct((1, n_alloc), jnp.float32),
        grid=(nb,),
        in_specs=in_specs,
        out_specs=pl.BlockSpec((1, tm), lambda i: (0, i)),     # lane-dense output row
        compiler_params=pltpu.CompilerParams(
            dimension_semantics=("parallel",)),
    )(*args)
    return out[0, :n]


def init_params(key, stack_depth, i_dim, h_dim):
    """Deterministic PyTorch-Linear-style init: U(-1/sqrt(fan_in), 1/sqrt(fan_in)),
    weights stored in PyTorch (out_features, in_features) layout."""
    ks = jax.random.split(key, 6)

    def uni(k, shape, fan_in):
        bound = 1.0 / jnp.sqrt(jnp.float32(fan_in))
        return jax.random.uniform(k, shape, jnp.float32, -bound, bound)

    w1 = uni(ks[0], (stack_depth, h_dim, i_dim), i_dim)    # Linear(iDim->hDim).weight
    b1 = uni(ks[1], (stack_depth, h_dim), i_dim)
    w2 = uni(ks[2], (stack_depth, i_dim, h_dim), h_dim)    # Linear(hDim->iDim).weight
    b2 = uni(ks[3], (stack_depth, i_dim), h_dim)
    wn = uni(ks[4], (1, i_dim), i_dim)                     # Linear(iDim->1).weight
    bn = uni(ks[5], (1,), i_dim)
    return (w1, b1, w2, b2, wn, bn)


if __name__ == "__main__":
    stack_depth, i_dim, h_dim = 2, 16, 32
    batch = 128

    key = jax.random.PRNGKey(0)
    k_in, k_params = jax.random.split(key)

    # Example input mirrors ArgMaxNet.process(): softmax(randn(batch, iDim), dim=1)
    raw = jax.random.normal(k_in, (batch, i_dim), jnp.float32)
    scores = jax.nn.softmax(raw, axis=1)

    params = init_params(k_params, stack_depth, i_dim, h_dim)

    out = argmaxnet_forward(scores, params)
    jax.block_until_ready(out)

    # Pure-JAX f32 reference of the original (unfused) forward pass.
    w1, b1, w2, b2, wn, bn = params
    h = scores
    for s in range(stack_depth):
        h = jnp.maximum(h @ w1[s].T + b1[s], 0.0) @ w2[s].T + b2[s]
    ref = jnp.abs(h @ wn.T + bn)[:, 0]

    assert out.shape == (batch,)
    # bf16 matmul operands + fused f32 weight products -> loosened tolerance.
    assert jnp.allclose(out, ref, atol=2e-2, rtol=2e-2), (out, ref)

    print("KERNEL_OK")
</pallas_src>

<mosaic_0001>
module attributes {stable_mosaic.version = 11 : i64} {
  func.func @kernel(%arg0: i32, %arg1: memref<128x16xf32, #tpu.memory_space<vmem>>, %arg2: memref<32x16xbf16, #tpu.memory_space<vmem>>, %arg3: memref<32x1xf32, #tpu.memory_space<vmem>>, %arg4: memref<1x32x32xbf16, #tpu.memory_space<vmem>>, %arg5: memref<1x32x1xf32, #tpu.memory_space<vmem>>, %arg6: memref<1x32xbf16, #tpu.memory_space<vmem>>, %arg7: memref<1x1xf32, #tpu.memory_space<smem>>, %arg8: memref<1x128xf32, #tpu.memory_space<vmem>>) attributes {dimension_semantics = [#tpu.dimension_semantics<parallel>], iteration_bounds = array<i64: 1>, scalar_prefetch = 0 : i64, scratch_operands = 0 : i64, tpu.core_type = #tpu.core_type<tc>, window_params = [{transform_indices = @transform_0, window_bounds = array<i64: 128, 16>}, {pipeline_mode = #tpu.pipeline_mode<synchronous>, transform_indices = @transform_1, window_bounds = array<i64: 32, 16>}, {pipeline_mode = #tpu.pipeline_mode<synchronous>, transform_indices = @transform_2, window_bounds = array<i64: 32, 1>}, {pipeline_mode = #tpu.pipeline_mode<synchronous>, transform_indices = @transform_3, window_bounds = array<i64: 1, 32, 32>}, {pipeline_mode = #tpu.pipeline_mode<synchronous>, transform_indices = @transform_4, window_bounds = array<i64: 1, 32, 1>}, {pipeline_mode = #tpu.pipeline_mode<synchronous>, transform_indices = @transform_5, window_bounds = array<i64: 1, 32>}, {transform_indices = @transform_6, window_bounds = array<i64: 1, 1>}, {transform_indices = @transform_7, window_bounds = array<i64: 1, 128>}]} {
    %c0 = arith.constant 0 : index
    %c0_0 = arith.constant 0 : index
    %0 = vector.load %arg1[%c0, %c0_0] : memref<128x16xf32, #tpu.memory_space<vmem>>, vector<128x16xf32>
    %1 = tpu.transpose %0, [1, 0] : vector<128x16xf32> -> vector<16x128xf32>
    %2 = arith.truncf %1 : vector<16x128xf32> to vector<16x128xbf16>
    %c0_1 = arith.constant 0 : index
    %c0_2 = arith.constant 0 : index
    %3 = vector.load %arg2[%c0_1, %c0_2] : memref<32x16xbf16, #tpu.memory_space<vmem>>, vector<32x16xbf16>
    %cst = arith.constant dense<0.000000e+00> : vector<32x128xf32>
    %4 = tpu.matmul %3, %2, %cst {dimension_numbers = #tpu.dot_dimension_numbers<[1], [0], [0], [1], [0, 0, 1, 1], [], []>} : vector<32x16xbf16>, vector<16x128xbf16>, vector<32x128xf32> -> vector<32x128xf32>
    %c0_3 = arith.constant 0 : index
    %c0_4 = arith.constant 0 : index
    %5 = vector.load %arg3[%c0_3, %c0_4] : memref<32x1xf32, #tpu.memory_space<vmem>>, vector<32x1xf32>
    %6 = vector.broadcast %5 : vector<32x1xf32> to vector<32x128xf32>
    %7 = arith.addf %4, %6 : vector<32x128xf32>
    %cst_5 = arith.constant 0.000000e+00 : f32
    %8 = vector.broadcast %cst_5 : f32 to vector<32x128xf32>
    %9 = arith.maximumf %7, %8 : vector<32x128xf32>
    %10 = arith.truncf %9 : vector<32x128xf32> to vector<32x128xbf16>
    %c0_6 = arith.constant 0 : index
    %c0_7 = arith.constant 0 : index
    %c0_8 = arith.constant 0 : index
    %11 = vector.load %arg4[%c0_6, %c0_7, %c0_8] : memref<1x32x32xbf16, #tpu.memory_space<vmem>>, vector<1x32x32xbf16>
    %12 = vector.shape_cast %11 : vector<1x32x32xbf16> to vector<32x32xbf16>
    %cst_9 = arith.constant dense<0.000000e+00> : vector<32x128xf32>
    %13 = tpu.matmul %12, %10, %cst_9 {dimension_numbers = #tpu.dot_dimension_numbers<[1], [0], [0], [1], [0, 0, 1, 1], [], []>} : vector<32x32xbf16>, vector<32x128xbf16>, vector<32x128xf32> -> vector<32x128xf32>
    %c0_10 = arith.constant 0 : index
    %c0_11 = arith.constant 0 : index
    %c0_12 = arith.constant 0 : index
    %14 = vector.load %arg5[%c0_10, %c0_11, %c0_12] : memref<1x32x1xf32, #tpu.memory_space<vmem>>, vector<1x32x1xf32>
    %15 = vector.shape_cast %14 : vector<1x32x1xf32> to vector<32x1xf32>
    %16 = vector.broadcast %15 : vector<32x1xf32> to vector<32x128xf32>
    %17 = arith.addf %13, %16 : vector<32x128xf32>
    %cst_13 = arith.constant 0.000000e+00 : f32
    %18 = vector.broadcast %cst_13 : f32 to vector<32x128xf32>
    %19 = arith.maximumf %17, %18 : vector<32x128xf32>
    %20 = arith.truncf %19 : vector<32x128xf32> to vector<32x128xbf16>
    %c0_14 = arith.constant 0 : index
    %c0_15 = arith.constant 0 : index
    %21 = vector.load %arg6[%c0_14, %c0_15] : memref<1x32xbf16, #tpu.memory_space<vmem>>, vector<1x32xbf16>
    %cst_16 = arith.constant dense<0.000000e+00> : vector<1x128xf32>
    %22 = tpu.matmul %21, %20, %cst_16 {dimension_numbers = #tpu.dot_dimension_numbers<[1], [0], [0], [1], [0, 0, 1, 1], [], []>} : vector<1x32xbf16>, vector<32x128xbf16>, vector<1x128xf32> -> vector<1x128xf32>
    %c0_17 = arith.constant 0 : index
    %c0_18 = arith.constant 0 : index
    %23 = memref.load %arg7[%c0_17, %c0_18] : memref<1x1xf32, #tpu.memory_space<smem>>
    %24 = vector.broadcast %23 : f32 to vector<1x128xf32>
    %25 = arith.addf %22, %24 : vector<1x128xf32>
    %26 = math.absf %25 : vector<1x128xf32>
    %c0_19 = arith.constant 0 : index
    %c0_20 = arith.constant 0 : index
    %27 = vector.load %arg8[%c0_19, %c0_20] : memref<1x128xf32, #tpu.memory_space<vmem>>, vector<1x128xf32>
    tpu.vector_store %arg8[%c0_19, %c0_20], %26 {strides = array<i32>} : memref<1x128xf32, #tpu.memory_space<vmem>>, vector<1x128xf32>,
    return
  }
  func.func @transform_0(%arg0: i32) -> (i32, i32) {
    %c0_i32 = arith.constant 0 : i32
    %c0_i32_0 = arith.constant 0 : i32
    return %arg0, %c0_i32 : i32, i32
  }
  func.func @transform_1(%arg0: i32) -> (i32, i32) {
    %c0_i32 = arith.constant 0 : i32
    %c0_i32_0 = arith.constant 0 : i32
    %c0_i32_1 = arith.constant 0 : i32
    return %c0_i32, %c0_i32_0 : i32, i32
  }
  func.func @transform_2(%arg0: i32) -> (i32, i32) {
    %c0_i32 = arith.constant 0 : i32
    %c0_i32_0 = arith.constant 0 : i32
    %c0_i32_1 = arith.constant 0 : i32
    return %c0_i32, %c0_i32_0 : i32, i32
  }
  func.func @transform_3(%arg0: i32) -> (i32, i32, i32) {
    %c0_i32 = arith.constant 0 : i32
    %c0_i32_0 = arith.constant 0 : i32
    %c0_i32_1 = arith.constant 0 : i32
    %c0_i32_2 = arith.constant 0 : i32
    return %c0_i32, %c0_i32_0, %c0_i32_1 : i32, i32, i32
  }
  func.func @transform_4(%arg0: i32) -> (i32, i32, i32) {
    %c0_i32 = arith.constant 0 : i32
    %c0_i32_0 = arith.constant 0 : i32
    %c0_i32_1 = arith.constant 0 : i32
    %c0_i32_2 = arith.constant 0 : i32
    return %c0_i32, %c0_i32_0, %c0_i32_1 : i32, i32, i32
  }
  func.func @transform_5(%arg0: i32) -> (i32, i32) {
    %c0_i32 = arith.constant 0 : i32
    %c0_i32_0 = arith.constant 0 : i32
    %c0_i32_1 = arith.constant 0 : i32
    return %c0_i32, %c0_i32_0 : i32, i32
  }
  func.func @transform_6(%arg0: i32) -> (i32, i32) {
    %c0_i32 = arith.constant 0 : i32
    %c0_i32_0 = arith.constant 0 : i32
    %c0_i32_1 = arith.constant 0 : i32
    return %c0_i32, %c0_i32_0 : i32, i32
  }
  func.func @transform_7(%arg0: i32) -> (i32, i32) {
    %c0_i32 = arith.constant 0 : i32
    %c0_i32_0 = arith.constant 0 : i32
    return %c0_i32, %arg0 : i32, i32
  }
}

</mosaic_0001>

<bundles_post_ra>
// kernel: tpu_custom_call.1
= control target key start
LH: loop header
LB: loop body
LE: loop exit
PB: predicated region body
PF: predicated region fallthrough
CT: control target
= control target key end

     0   :  { %s566_s0 = inlined_call_operand.vmem [shape: f32[128,16], index: 0, kind: input, shape index: {}]   ;;  %s567_s1 = inlined_call_operand.vmem [shape: bf16[32,16], index: 1, kind: input, shape index: {}]   ;;  %s568_s2 = inlined_call_operand.vmem [shape: f32[32,1], index: 2, kind: input, shape index: {}]   ;;  %s569_s3 = inlined_call_operand.vmem [shape: bf16[1,32,32], index: 3, kind: input, shape index: {}]   ;;  %s570_s4 = inlined_call_operand.vmem [shape: f32[1,32,1], index: 4, kind: input, shape index: {}]   ;;  %s571_s5 = inlined_call_operand.vmem [shape: bf16[1,32], index: 5, kind: input, shape index: {}]   ;;  %s572_s6 = inlined_call_operand.<no memory space> [shape: f32[1,1], index: 6, kind: input, shape index: {}]   ;;  %s573_s7 = inlined_call_operand.hbm [shape: f32[1,128], index: 7, kind: output, shape index: {}]  }
   0x1   :  { %v29_v0 = vld [vmem:[%s566_s0] sm:$0xff]  ;;  %v30_v1 = vld [vmem:[%s566_s0 + $0x8] sm:$0xff]  ;;  %v31_v2 = vld [vmem:[%s566_s0 + $0x10] sm:$0xff] }
   0x2   :  { %45 = vxpose.xlu0.b32.start [1/16] (narrow) %v29_v0, 16 }
   0x6   :  { %46 = vxpose.xlu0.b32.cont [2/16] (narrow) %v30_v1, 16 }
   0x7   :  { %13 = vsyncpa [#allocation4], 0  ;;  %v387_v3 = vld [vmem:[%s567_s1] sm:$0xff]   ;;  %vm116_vm0 = vcmask 130048   ;;  %v32_v4 = vld [vmem:[%s566_s0 + $0x18] sm:$0xff]  ;;  %v415_v6 = vmov 0  }
   0x8   :  { %361 = vmatprep.mubr.msk.bf16.mxu0 %vm116_vm0, %v387_v3  ;;  %v82_v5 = vld [vmem:[%s568_s2] sm:$0xff]  ;;  %385 = vset.pattern.permute.xlu1 %v415_v6  ;;  %v83_v8 = vld [vmem:[%s568_s2 + $0x8] sm:$0xff]  ;;  %v84_v10 = vld [vmem:[%s568_s2 + $0x10] sm:$0xff]  ;;  %vm216_vm1 = vcmask 261120   ;;  %v416_v50 = vmov 0.0   ;;  %vm417_vm2 = vmmov 0  }
   0x9   :  { %v33_v7 = vld [vmem:[%s566_s0 + $0x20] sm:$0xff]  ;;  %88 = vperm.xlu1 %385, %v82_v5   ;;  %v34_v9 = vld [vmem:[%s566_s0 + $0x28] sm:$0xff]  ;;  %v35_v11 = vld [vmem:[%s566_s0 + $0x30] sm:$0xff] }
   0xa   :  { %47 = vxpose.xlu0.b32.cont [3/16] (narrow) %v31_v2, 16  ;;  %v85_v12 = vld [vmem:[%s568_s2 + $0x18] sm:$0xff]  ;;  %v182_v14 = vld [vmem:[%s570_s4] sm:$0xff]  ;;  %v183_v16 = vld [vmem:[%s570_s4 + $0x8] sm:$0xff]  ;;  %s418_s2 = smov [#allocation3]  }
   0xb   :  { %v36_v13 = vld [vmem:[%s566_s0 + $0x38] sm:$0xff]  ;;  %v37_v15 = vld [vmem:[%s566_s0 + $0x40] sm:$0xff]  ;;  %v38_v17 = vld [vmem:[%s566_s0 + $0x48] sm:$0xff]  ;;  %s332_s10 = sshll.u32 %s418_s2, 4  ;;  %s333_s10 = int_to_ptr.vmem [resolvable:$true] %s332_s10 }
   0xc   :  { %v184_v18 = vld [vmem:[%s570_s4 + $0x10] sm:$0xff]  ;;  %v185_v20 = vld [vmem:[%s570_s4 + $0x18] sm:$0xff]  ;;  %v41_v22 = vld [vmem:[%s566_s0 + $0x60] sm:$0xff]  ;;  %s391_s11 = scalar_lea.vmem %s333_s10, 16  ;;  %s395_s12 = scalar_lea.vmem %s333_s10, 32 }
   0xd   :  { %93 = vperm.xlu1 %385, %v83_v8   ;;  %v39_v19 = vld [vmem:[%s566_s0 + $0x50] sm:$0xff]  ;;  %v40_v21 = vld [vmem:[%s566_s0 + $0x58] sm:$0xff]  ;;  %v42_v23 = vld [vmem:[%s566_s0 + $0x68] sm:$0xff]  ;;  %p392_p0 = scmp.ne.s32.totalorder %s333_s10, %s391_s11  ;;  %p396_p1 = scmp.lt.s32.totalorder %s333_s10, %s333_s10 }
   0xe   :  { %48 = vxpose.xlu0.b32.cont [4/16] (narrow) %v32_v4, 16  ;;  %v43_v24 = vld [vmem:[%s566_s0 + $0x70] sm:$0xff]  ;;  %v44_v25 = vld [vmem:[%s566_s0 + $0x78] sm:$0xff]  ;;  %v388_v29 = vld [vmem:[%s567_s1 + $0x8] sm:$0xff]   ;;  %p397_p2 = scmp.lt.s32.totalorder %s395_s12, %s391_s11 }
   0xf   :  { %v389_v30 = vld [vmem:[%s569_s3] sm:$0xff]   ;;  %v390_v49 = vld [vmem:[%s569_s3 + $0x8] sm:$0xff]  }
  0x10   :  { %369 = vmatprep.mubr.msk.bf16.mxu1 %vm216_vm1, %v389_v30  ;;  %v278_v5 = vld [vmem:[%s571_s5] sm:$0x1]  ;;  %p398_p3 = por %p397_p2, %p396_p1 }
  0x11   :  { %98 = vperm.xlu1 %385, %v84_v10  }
  0x12   :  { %49 = vxpose.xlu0.b32.cont [5/16] (narrow) %v33_v7, 16  ;;  %p399_p4 = pnand %p398_p3, %p392_p0 }
  0x15   :  { %103 = vperm.xlu1 %385, %v85_v12  }
  0x16   :  { %50 = vxpose.xlu0.b32.cont [6/16] (narrow) %v34_v9, 16 }
  0x19   :  { %188 = vperm.xlu1 %385, %v182_v14  }
  0x1a   :  { %51 = vxpose.xlu0.b32.cont [7/16] (narrow) %v35_v11, 16 }
  0x1d   :  { %193 = vperm.xlu1 %385, %v183_v16  }
  0x1e   :  { %52 = vxpose.xlu0.b32.cont [8/16] (narrow) %v36_v13, 16 }
  0x21   :  { %198 = vperm.xlu1 %385, %v184_v18  }
  0x22   :  { %53 = vxpose.xlu0.b32.cont [9/16] (narrow) %v37_v15, 16 }
  0x25   :  { %203 = vperm.xlu1 %385, %v185_v20  }
  0x26   :  { %54 = vxpose.xlu0.b32.cont [10/16] (narrow) %v38_v17, 16 }
  0x2a   :  { %55 = vxpose.xlu0.b32.cont [11/16] (narrow) %v39_v19, 16 }
  0x2e   :  { %56 = vxpose.xlu0.b32.cont [12/16] (narrow) %v40_v21, 16 }
  0x32   :  { %57 = vxpose.xlu0.b32.cont [13/16] (narrow) %v41_v22, 16 }
  0x36   :  { %58 = vxpose.xlu0.b32.cont [14/16] (narrow) %v42_v23, 16 }
  0x3a   :  { %59 = vxpose.xlu0.b32.cont [15/16] (narrow) %v43_v24, 16 }
  0x3e   :  { %60 = vxpose.xlu0.b32.end [16/16] (narrow) %v44_v25, 16 }
  0x67   :  { %386 = vset.pattern.permute.xlu0 %v415_v6  ;;  %v280_v6 = vstv %s572_s6 }
  0x82   :  { %v61_v26 = vpop.trf.xlu0 }
  0x86   :  { %v62_v27 = vpop.trf.xlu0 }
  0x87   :  { %v77_v28 = vpack.c.bf16 %v62_v27, %v61_v26 }
  0x88   :  { %v89_v31 = vpop.permute.xlu1 %88 }
  0x89   :  { %359 = vmatprep.subr.bf16.mxu0 %v77_v28 }
  0x8a   :  { %360 = vmatpush3.bf16.msra.mxu0 %v77_v28 }
  0x8b   :  { %373 = vmatprep.subr.bf16.mxu0 %v416_v50 }
  0x8c   :  { %v94_v32 = vpop.permute.xlu1 %93 }
  0x8d   :  { %362 = vmatmul.mubr.msk.bf16.vlgmr.msra.gmra.mrb[0].mxu0 %vm116_vm0, %v388_v29 }
  0x8e   :  { %377 = vmatprep.mubr.msk.bf16.mxu0 %vm417_vm2, %v416_v50 }
  0x90   :  { %v99_v33 = vpop.permute.xlu1 %98 }
  0x94   :  { %v104_v37 = vpop.permute.xlu1 %103 }
  0x98   :  { %v189_v51 = vpop.permute.xlu1 %188 }
  0x9c   :  { %v194_v52 = vpop.permute.xlu1 %193 }
  0xa0   :  { %v199_v53 = vpop.permute.xlu1 %198 }
  0xa4   :  { %v204_v57 = vpop.permute.xlu1 %203 }
 0x160   :  { %v363_v34 = vpop.f32.mrb[0].mxu0 }
 0x161   :  { %v166_v35 = vadd.f32 %v363_v34, %v99_v33  ;;  %v157_v36 = vpop.f32.mrb[1].mxu0 }
 0x162   :  { %v158_v38 = vadd.f32 %v157_v36, %v89_v31  ;;  %v364_v39 = vpop.f32.mrb[2].mxu0 }
 0x163   :  { %v169_v40 = vadd.f32 %v364_v39, %v104_v37  ;;  %v160_v41 = vpop.f32.mrb[3].mxu0  ;;  %v174_v43 = vmax.f32 %v166_v35, 0.0 }
 0x164   :  { %v161_v42 = vadd.f32 %v160_v41, %v94_v32  ;;  %v172_v45 = vmax.f32 %v158_v38, 0.0 }
 0x165   :  { %v175_v44 = vmax.f32 %v169_v40, 0.0 }
 0x166   :  { %v173_v46 = vmax.f32 %v161_v42, 0.0 }
 0x167   :  { %v177_v47 = vpack.c.bf16 %v175_v44, %v174_v43 }
 0x168   :  { %v176_v48 = vpack.c.bf16 %v173_v46, %v172_v45 }
 0x16a   :  { %365 = vmatprep.subr.bf16.mxu1 %v176_v48 }
 0x16b   :  { %366 = vmatpush3.bf16.msra.mxu1 %v176_v48 }
 0x16c   :  { %367 = vmatprep.subr.bf16.mxu1 %v177_v47 }
 0x16f   :  { %368 = vmatpush3.bf16.msra.mxu1 %v177_v47 }
 0x172   :  { %370 = vmatmul.mubr.msk.bf16.vlgmr.msra.gmra.mrb[0].mxu1 %vm216_vm1, %v390_v49 }
 0x245   :  { %v371_v54 = vpop.f32.mrb[0].mxu1 }
 0x246   :  { %v266_v55 = vadd.f32 %v371_v54, %v199_v53  ;;  %v257_v56 = vpop.f32.mrb[1].mxu1 }
 0x247   :  { %v258_v58 = vadd.f32 %v257_v56, %v189_v51  ;;  %v372_v59 = vpop.f32.mrb[2].mxu1 }
 0x248   :  { %v269_v60 = vadd.f32 %v372_v59, %v204_v57  ;;  %v260_v61 = vpop.f32.mrb[3].mxu1  ;;  %v274_v63 = vmax.f32 %v266_v55, 0.0 }
 0x249   :  { %v261_v62 = vadd.f32 %v260_v61, %v194_v52  ;;  %v272_v1 = vmax.f32 %v258_v58, 0.0 }
 0x24a   :  { %v275_v0 = vmax.f32 %v269_v60, 0.0 }
 0x24b   :  { %v273_v2 = vmax.f32 %v261_v62, 0.0 }
 0x24c   :  { %v277_v3 = vpack.c.bf16 %v275_v0, %v274_v63 }
 0x24d   :  { %v276_v4 = vpack.c.bf16 %v273_v2, %v272_v1 }
 0x24f   :  { %374 = vmatpush3.bf16.msra.mxu0 %v276_v4 }
 0x250   :  { %375 = vmatprep.subr.bf16.mxu0 %v416_v50 }
 0x253   :  { %376 = vmatpush3.bf16.msra.mxu0 %v277_v3 }
 0x256   :  { %378 = vmatmul.mubr.msk.bf16.vlgmr.msra.gmra.mrb[4].mxu0 %vm216_vm1, %v278_v5 }
 0x329   :  { %v318_v7 = vpop.f32.mrb[4].mxu0 }
 0x32a   :  { %v319_v8 = vadd.f32 %v318_v7, %v280_v6  ;;  %v379_v9 = vpop.f32.mrb[5].mxu0 }
 0x32b   :  { %v321_v10 = vpop.f32.mrb[6].mxu0 }
 0x32c   :  { %v324_v11 = vand.u32 2147483647, %v319_v8  ;;  %v380_v12 = vpop.f32.mrb[7].mxu0 }
 0x32e   :  { %325 = vst [vmem:[#allocation3] sm:$0x1] %v324_v11 }
 0x32f   :  { %402 = shalt.err (!%p399_p4)
}
 0x330   :  { %s403_s13 = scalar_lea.hbm %s573_s7, 16 }
 0x331   :  { %p404_p5 = scmp.ne.s32.totalorder %s573_s7, %s403_s13  ;;  %p407_p6 = scmp.lt.u32.totalorder %s403_s13, %s573_s7 }
 0x333   :  { %p409_p7 = pnand %p407_p6, %p404_p5 }
 0x335   :  { %412 = shalt.err (!%p409_p7)
}
 0x336   :  { %335 = dma.vmem_to_hbm [thread:$0]  %s333_s10, 16, %s573_s7, [#allocation4]  }
 0x337   :  { %413 = dma.done.wait [#allocation4], 16  }
 0x338   :  { %414 = vsyncadd [#allocation4], 4294967280 }
 0x339   :  { %339 = vsyncpa [#allocation4], 1 }

</bundles_post_ra>
